<compile_context>
chip_gen: v7x
topology: tpu7x:2x2x1
jax: 0.10.0
libtpu: 0.0.40
codegen_flags: <defaults>
</compile_context>

<pallas_src>
import functools

import jax
import jax.numpy as jnp
import numpy as np
from jax.experimental import pallas as pl
from jax.experimental.pallas import tpu as pltpu


def _round_up(x, m):
    return -(-x // m) * m


# ---------------------------------------------------------------------------
# Pallas kernels
# ---------------------------------------------------------------------------
def _encoder_kernel(x_ref, w_ref, b_ref, o_ref):
    """o = relu(x @ w + b).  x/w are bf16 (MXU inputs), accumulate/bias/relu in f32."""
    acc = jnp.dot(x_ref[...], w_ref[...], preferred_element_type=jnp.float32)
    acc = acc + b_ref[...]
    o_ref[...] = jnp.maximum(acc, 0.0).astype(o_ref.dtype)


def encoder_linear_relu(x, w, b, *, tm):
    """x: (M, K) bf16 @ w: (K, F) bf16 + b: (1, F) f32 -> (M, F) f32, grid over M tiles."""
    M, K = x.shape
    Kw, F = w.shape
    assert Kw == K and M % tm == 0
    grid_m = M // tm
    return pl.pallas_call(
        _encoder_kernel,
        out_shape=jax.ShapeDtypeStruct((M, F), jnp.float32),
        grid_spec=pl.GridSpec(
            grid=(grid_m,),
            in_specs=[
                pl.BlockSpec((tm, K), lambda i: (i, 0)),
                pl.BlockSpec((K, F), lambda i: (0, 0)),
                pl.BlockSpec((1, F), lambda i: (0, 0)),
            ],
            out_specs=pl.BlockSpec((tm, F), lambda i: (i, 0)),
        ),
        compiler_params=pltpu.CompilerParams(
            dimension_semantics=("parallel",),
            vmem_limit_bytes=32 * 1024 * 1024),
    )(x, w, b)


def _decoder_l1_kernel(f_ref, w_ref, b_ref, t_ref, o_ref, part_ref, *,
                       tm, m_valid, m_padded):
    """recon = f @ w + b, plus fused L1-loss epilogue.

    The abs/sum rides the free VPU slots while the MXU is busy; each grid block
    writes its own lane-dense (8, K) partial sum (no cross-grid accumulator, so
    the M axis stays 'parallel')."""
    recon = jnp.dot(f_ref[...].astype(jnp.bfloat16), w_ref[...],
                    preferred_element_type=jnp.float32)
    recon = recon + b_ref[...]
    o_ref[...] = recon.astype(o_ref.dtype)

    diff = jnp.abs(recon - t_ref[...])
    if m_padded != m_valid:  # mask rows introduced by rounding M up to a tile multiple
        row = (jax.lax.broadcasted_iota(jnp.int32, diff.shape, 0)
               + pl.program_id(0) * tm)
        diff = jnp.where(row < m_valid, diff, 0.0)

    # Reduce (tm, K) -> (8, K) with tile-aligned static slices + VPU adds
    # (no cross-lane XLU reduce, no in-kernel reshape).
    acc = diff[0:8, :]
    for j in range(1, tm // 8):
        acc = acc + diff[j * 8:(j + 1) * 8, :]
    part_ref[...] = acc


def decoder_linear_l1(feat, w, b, target, *, tm, m_valid):
    """feat: (M, F) f32 @ w: (F, K) bf16 + b -> recon tokens (M, K) f32,
    plus per-block (8, K) partial sums of |recon - target| (L1 fused epilogue)."""
    M, F = feat.shape
    Fw, K = w.shape
    assert Fw == F and M % tm == 0 and tm % 8 == 0
    grid_m = M // tm
    kernel = functools.partial(_decoder_l1_kernel, tm=tm, m_valid=m_valid, m_padded=M)
    recon, partials = pl.pallas_call(
        kernel,
        out_shape=(jax.ShapeDtypeStruct((M, K), jnp.float32),
                   jax.ShapeDtypeStruct((grid_m * 8, K), jnp.float32)),
        grid_spec=pl.GridSpec(
            grid=(grid_m,),
            in_specs=[
                pl.BlockSpec((tm, F), lambda i: (i, 0)),
                pl.BlockSpec((F, K), lambda i: (0, 0)),
                pl.BlockSpec((1, K), lambda i: (0, 0)),
                pl.BlockSpec((tm, K), lambda i: (i, 0)),
            ],
            out_specs=(
                pl.BlockSpec((tm, K), lambda i: (i, 0)),
                pl.BlockSpec((8, K), lambda i: (i, 0)),
            ),
        ),
        compiler_params=pltpu.CompilerParams(
            dimension_semantics=("parallel",),
            vmem_limit_bytes=32 * 1024 * 1024),
    )(feat, w, b, target)
    return recon, partials


# ---------------------------------------------------------------------------
# Plain-JAX glue (padding / patch reshape)
# ---------------------------------------------------------------------------
def pad_to_divisibility(x, div, fill=None):
    """ImageList.from_tensors(images, div): pad bottom/right to a multiple of `div`.
    fill=None -> zero pad; fill=(C,) -> per-channel constant pad."""
    N, C, H, W = x.shape
    Hp = _round_up(H, div)
    Wp = _round_up(W, div)
    if Hp == H and Wp == W:
        return x
    if fill is None:
        return jnp.pad(x, ((0, 0), (0, 0), (0, Hp - H), (0, Wp - W)))
    base = jnp.broadcast_to(fill.reshape(1, C, 1, 1), (N, C, Hp, Wp)).astype(x.dtype)
    return jax.lax.dynamic_update_slice(base, x, (0, 0, 0, 0))


def patchify(x, P):
    N, C, H, W = x.shape
    Hp, Wp = H // P, W // P
    x = x.reshape(N, C, Hp, P, Wp, P).transpose(0, 2, 4, 1, 3, 5)
    return x.reshape(N, Hp * Wp, C * P * P)


def unpatchify(tokens, C, H, W, P):
    N = tokens.shape[0]
    Hp, Wp = H // P, W // P
    x = tokens.reshape(N, Hp, Wp, C, P, P).transpose(0, 3, 1, 4, 2, 5)
    return x.reshape(N, C, H, W)


# ---------------------------------------------------------------------------
# CFPN inference (eval-mode forward path of the PyTorch module)
# ---------------------------------------------------------------------------
def cfpn_inference(images, params, *, patch=4, size_divisibility=32):
    # TODO(synk): detectron2 CFPN uses size_divisibility=512; reduced for demo shapes.
    N, C, H, W = images.shape
    pixel_mean = params["pixel_mean"].reshape(-1).astype(jnp.float32)
    pixel_std = params["pixel_std"].reshape(-1).astype(jnp.float32)

    # preprocess_image(norm=False): raw, zero-padded (ImageList) -> loss/recon target.
    raw = pad_to_divisibility(images, size_divisibility)
    # preprocess_image(norm=True) is FOLDED into the encoder weights; padding the raw
    # image with per-channel `mean` keeps the padded border exactly 0 post-fold.
    enc_in = pad_to_divisibility(images, size_divisibility, fill=pixel_mean)
    _, _, Hpad, Wpad = raw.shape
    Hg, Wg = Hpad // patch, Wpad // patch
    L = Hg * Wg
    M = N * L

    # --- fold (x - mean)/std into the synthetic backbone's first linear ---------
    w_enc0 = params["w_enc"].astype(jnp.float32)            # (K, FEAT)
    b_enc0 = params["b_enc"].reshape(-1).astype(jnp.float32)
    K0, FEAT = w_enc0.shape
    assert K0 == C * patch * patch
    inv_std_k = jnp.repeat(1.0 / pixel_std, patch * patch)  # token layout is channel-major
    mean_k = jnp.repeat(pixel_mean, patch * patch)
    w_enc = w_enc0 * inv_std_k[:, None]
    b_enc = b_enc0 - (mean_k * inv_std_k) @ w_enc0

    w_dec0 = params["w_dec"].astype(jnp.float32)             # (FEAT, K)
    b_dec0 = params["b_dec"].reshape(-1).astype(jnp.float32)

    # --- lane-pad output feature dims to multiples of 128 (zero pad) ------------
    F_PAD = _round_up(FEAT, 128)
    K_PAD = _round_up(K0, 128)
    w_enc_p = jnp.zeros((K0, F_PAD), jnp.float32).at[:, :FEAT].set(w_enc).astype(jnp.bfloat16)
    b_enc_p = jnp.zeros((1, F_PAD), jnp.float32).at[0, :FEAT].set(b_enc)
    w_dec_p = jnp.zeros((F_PAD, K_PAD), jnp.float32).at[:FEAT, :K0].set(w_dec0).astype(jnp.bfloat16)
    b_dec_p = jnp.zeros((1, K_PAD), jnp.float32).at[0, :K0].set(b_dec0)

    # --- patchify: (N,C,H,W) -> (N*L, C*P*P) tokens ------------------------------
    # TODO(synk): at production resolutions express this patch gather via BlockSpec
    # index_maps (grid over patch rows) instead of an XLA 6-D transpose HBM copy.
    tokens = patchify(enc_in, patch).reshape(M, K0).astype(jnp.bfloat16)  # encoder MXU LHS
    target = patchify(raw, patch).reshape(M, K0)                           # f32 loss target
    target = jnp.pad(target, ((0, 0), (0, K_PAD - K0)))                    # lane-dense tiles

    # --- tile the flattened token (M = N*L) dimension ----------------------------
    tm = 512 if M >= 512 else _round_up(M, 16)
    M_pad = _round_up(M, tm)
    if M_pad != M:
        tokens = jnp.pad(tokens, ((0, M_pad - M), (0, 0)))
        target = jnp.pad(target, ((0, M_pad - M), (0, 0)))

    # --- synthetic backbone: stride-P patchify-conv == tokens @ w_enc + b, relu --
    # TODO(synk): real backbone is registry-built (build_backbone(cfg)); synthetic stand-in.
    feat_p = encoder_linear_relu(tokens, w_enc_p, b_enc_p, tm=tm)          # (M_pad, F_PAD)

    # --- synthetic reconstruct head: linear back to pixels + fused L1 loss -------
    # TODO(synk): real reconstruct_heads are registry-built; synthetic stand-in.
    recon_tok_p, loss_partials = decoder_linear_l1(
        feat_p, w_dec_p, b_dec_p, target, tm=tm, m_valid=M)

    loss = jnp.sum(loss_partials) / (N * C * Hpad * Wpad)

    recon_tok = recon_tok_p[:M, :K0].reshape(N, L, K0)
    recon = unpatchify(recon_tok, C, Hpad, Wpad, patch)                    # (N, C, Hpad, Wpad)
    feat_map = feat_p[:M, :FEAT].reshape(N, Hg, Wg, FEAT).transpose(0, 3, 1, 2)
    return {"recon": recon, "p2": feat_map, "reconstruction_loss": loss}


# ---------------------------------------------------------------------------
# Pure-JAX reference (f32, unfolded) for a correctness sanity check
# ---------------------------------------------------------------------------
def cfpn_reference(images, params, *, patch, size_divisibility):
    mean = params["pixel_mean"].reshape(1, -1, 1, 1)
    std = params["pixel_std"].reshape(1, -1, 1, 1)
    normed = pad_to_divisibility((images - mean) / std, size_divisibility)
    raw = pad_to_divisibility(images, size_divisibility)
    N, C, Hp, Wp = raw.shape
    tok = patchify(normed, patch)
    feat = jnp.maximum(
        jnp.einsum("nlk,kf->nlf", tok, params["w_enc"]) + params["b_enc"].reshape(1, 1, -1),
        0.0)
    rec_tok = jnp.einsum("nlf,fk->nlk", feat, params["w_dec"]) + params["b_dec"].reshape(1, 1, -1)
    recon = unpatchify(rec_tok, C, Hp, Wp, patch)
    loss = jnp.mean(jnp.abs(recon - raw))
    feat_map = feat.reshape(N, Hp // patch, Wp // patch, -1).transpose(0, 3, 1, 2)
    return {"recon": recon, "p2": feat_map, "reconstruction_loss": loss}


# ---------------------------------------------------------------------------
# Demo
# ---------------------------------------------------------------------------
if __name__ == "__main__":
    N, C, H, W = 2, 3, 32, 32
    PATCH, FEAT = 4, 32
    K = C * PATCH * PATCH  # 48

    key = jax.random.PRNGKey(0)
    k_img, k_we, k_be, k_wd, k_bd = jax.random.split(key, 5)

    # batched_inputs images: (C, H, W) pixel values, stacked into NCHW float32
    images = jax.random.uniform(k_img, (N, C, H, W), jnp.float32, 0.0, 255.0)

    params = {
        # detectron2-style BGR pixel stats, shaped (C, 1, 1) like the module
        "pixel_mean": jnp.array([103.530, 116.280, 123.675], jnp.float32).reshape(C, 1, 1),
        "pixel_std": jnp.array([57.375, 57.120, 58.395], jnp.float32).reshape(C, 1, 1),
        "w_enc": 0.02 * jax.random.normal(k_we, (K, FEAT), jnp.float32),
        "b_enc": 0.01 * jax.random.normal(k_be, (1, FEAT), jnp.float32),
        "w_dec": 0.02 * jax.random.normal(k_wd, (FEAT, K), jnp.float32),
        "b_dec": 0.01 * jax.random.normal(k_bd, (1, K), jnp.float32),
    }

    run = jax.jit(functools.partial(cfpn_inference, patch=PATCH, size_divisibility=32))
    out = run(images, params)
    out = jax.tree_util.tree_map(jax.block_until_ready, out)

    assert out["recon"].shape == (N, C, H, W)
    assert out["p2"].shape == (N, FEAT, H // PATCH, W // PATCH)

    # sanity check vs. the plain-JAX f32 reference (loose tolerances: kernel uses
    # bf16 MXU inputs with f32 accumulation).
    ref = cfpn_reference(images, params, patch=PATCH, size_divisibility=32)
    np.testing.assert_allclose(np.asarray(out["p2"]), np.asarray(ref["p2"]),
                               rtol=1e-1, atol=1e-2)
    np.testing.assert_allclose(np.asarray(out["recon"]), np.asarray(ref["recon"]),
                               rtol=1e-1, atol=5e-3)
    np.testing.assert_allclose(float(out["reconstruction_loss"]),
                               float(ref["reconstruction_loss"]), rtol=1e-2)
    print("KERNEL_OK")
</pallas_src>

<mosaic_0001>
module attributes {stable_mosaic.version = 11 : i64} {
  func.func @_encoder_kernel(%arg0: i32, %arg1: memref<128x48xbf16, #tpu.memory_space<vmem>>, %arg2: memref<48x128xbf16, #tpu.memory_space<vmem>>, %arg3: memref<1x128xf32, #tpu.memory_space<vmem>>, %arg4: memref<128x128xf32, #tpu.memory_space<vmem>>) attributes {dimension_semantics = [#tpu.dimension_semantics<parallel>], iteration_bounds = array<i64: 1>, scalar_prefetch = 0 : i64, scratch_operands = 0 : i64, tpu.core_type = #tpu.core_type<tc>, window_params = [{transform_indices = @transform_0, window_bounds = array<i64: 128, 48>}, {pipeline_mode = #tpu.pipeline_mode<synchronous>, transform_indices = @transform_1, window_bounds = array<i64: 48, 128>}, {pipeline_mode = #tpu.pipeline_mode<synchronous>, transform_indices = @transform_2, window_bounds = array<i64: 1, 128>}, {transform_indices = @transform_3, window_bounds = array<i64: 128, 128>}]} {
    %c0 = arith.constant 0 : index
    %c0_0 = arith.constant 0 : index
    %0 = vector.load %arg1[%c0, %c0_0] : memref<128x48xbf16, #tpu.memory_space<vmem>>, vector<128x48xbf16>
    %c0_1 = arith.constant 0 : index
    %c0_2 = arith.constant 0 : index
    %1 = vector.load %arg2[%c0_1, %c0_2] : memref<48x128xbf16, #tpu.memory_space<vmem>>, vector<48x128xbf16>
    %cst = arith.constant dense<0.000000e+00> : vector<128x128xf32>
    %2 = tpu.matmul %0, %1, %cst {dimension_numbers = #tpu.dot_dimension_numbers<[1], [0], [0], [1], [0, 0, 1, 1], [], []>} : vector<128x48xbf16>, vector<48x128xbf16>, vector<128x128xf32> -> vector<128x128xf32>
    %c0_3 = arith.constant 0 : index
    %c0_4 = arith.constant 0 : index
    %3 = vector.load %arg3[%c0_3, %c0_4] : memref<1x128xf32, #tpu.memory_space<vmem>>, vector<1x128xf32>
    %4 = vector.broadcast %3 : vector<1x128xf32> to vector<128x128xf32>
    %5 = arith.addf %2, %4 : vector<128x128xf32>
    %cst_5 = arith.constant 0.000000e+00 : f32
    %6 = vector.broadcast %cst_5 : f32 to vector<128x128xf32>
    %7 = arith.maximumf %5, %6 : vector<128x128xf32>
    %c0_6 = arith.constant 0 : index
    %c0_7 = arith.constant 0 : index
    %8 = vector.load %arg4[%c0_6, %c0_7] : memref<128x128xf32, #tpu.memory_space<vmem>>, vector<128x128xf32>
    tpu.vector_store %arg4[%c0_6, %c0_7], %7 {strides = array<i32>} : memref<128x128xf32, #tpu.memory_space<vmem>>, vector<128x128xf32>,
    return
  }
  func.func @transform_0(%arg0: i32) -> (i32, i32) {
    %c0_i32 = arith.constant 0 : i32
    %c0_i32_0 = arith.constant 0 : i32
    return %arg0, %c0_i32 : i32, i32
  }
  func.func @transform_1(%arg0: i32) -> (i32, i32) {
    %c0_i32 = arith.constant 0 : i32
    %c0_i32_0 = arith.constant 0 : i32
    %c0_i32_1 = arith.constant 0 : i32
    return %c0_i32, %c0_i32_0 : i32, i32
  }
  func.func @transform_2(%arg0: i32) -> (i32, i32) {
    %c0_i32 = arith.constant 0 : i32
    %c0_i32_0 = arith.constant 0 : i32
    %c0_i32_1 = arith.constant 0 : i32
    return %c0_i32, %c0_i32_0 : i32, i32
  }
  func.func @transform_3(%arg0: i32) -> (i32, i32) {
    %c0_i32 = arith.constant 0 : i32
    %c0_i32_0 = arith.constant 0 : i32
    return %arg0, %c0_i32 : i32, i32
  }
}

module attributes {stable_mosaic.version = 11 : i64} {
  func.func @_decoder_l1_kernel(%arg0: i32, %arg1: memref<128x128xf32, #tpu.memory_space<vmem>>, %arg2: memref<128x128xbf16, #tpu.memory_space<vmem>>, %arg3: memref<1x128xf32, #tpu.memory_space<vmem>>, %arg4: memref<128x128xf32, #tpu.memory_space<vmem>>, %arg5: memref<128x128xf32, #tpu.memory_space<vmem>>, %arg6: memref<8x128xf32, #tpu.memory_space<vmem>>) attributes {dimension_semantics = [#tpu.dimension_semantics<parallel>], iteration_bounds = array<i64: 1>, scalar_prefetch = 0 : i64, scratch_operands = 0 : i64, tpu.core_type = #tpu.core_type<tc>, window_params = [{transform_indices = @transform_0, window_bounds = array<i64: 128, 128>}, {pipeline_mode = #tpu.pipeline_mode<synchronous>, transform_indices = @transform_1, window_bounds = array<i64: 128, 128>}, {pipeline_mode = #tpu.pipeline_mode<synchronous>, transform_indices = @transform_2, window_bounds = array<i64: 1, 128>}, {transform_indices = @transform_3, window_bounds = array<i64: 128, 128>}, {transform_indices = @transform_4, window_bounds = array<i64: 128, 128>}, {transform_indices = @transform_5, window_bounds = array<i64: 8, 128>}]} {
    %c0 = arith.constant 0 : index
    %c0_0 = arith.constant 0 : index
    %0 = vector.load %arg1[%c0, %c0_0] : memref<128x128xf32, #tpu.memory_space<vmem>>, vector<128x128xf32>
    %1 = arith.truncf %0 : vector<128x128xf32> to vector<128x128xbf16>
    %c0_1 = arith.constant 0 : index
    %c0_2 = arith.constant 0 : index
    %2 = vector.load %arg2[%c0_1, %c0_2] : memref<128x128xbf16, #tpu.memory_space<vmem>>, vector<128x128xbf16>
    %cst = arith.constant dense<0.000000e+00> : vector<128x128xf32>
    %3 = tpu.matmul %1, %2, %cst {dimension_numbers = #tpu.dot_dimension_numbers<[1], [0], [0], [1], [0, 0, 1, 1], [], []>} : vector<128x128xbf16>, vector<128x128xbf16>, vector<128x128xf32> -> vector<128x128xf32>
    %c0_3 = arith.constant 0 : index
    %c0_4 = arith.constant 0 : index
    %4 = vector.load %arg3[%c0_3, %c0_4] : memref<1x128xf32, #tpu.memory_space<vmem>>, vector<1x128xf32>
    %5 = vector.broadcast %4 : vector<1x128xf32> to vector<128x128xf32>
    %6 = arith.addf %3, %5 : vector<128x128xf32>
    %c0_5 = arith.constant 0 : index
    %c0_6 = arith.constant 0 : index
    %7 = vector.load %arg5[%c0_5, %c0_6] : memref<128x128xf32, #tpu.memory_space<vmem>>, vector<128x128xf32>
    tpu.vector_store %arg5[%c0_5, %c0_6], %6 {strides = array<i32>} : memref<128x128xf32, #tpu.memory_space<vmem>>, vector<128x128xf32>,
    %c0_7 = arith.constant 0 : index
    %c0_8 = arith.constant 0 : index
    %8 = vector.load %arg4[%c0_7, %c0_8] : memref<128x128xf32, #tpu.memory_space<vmem>>, vector<128x128xf32>
    %9 = arith.subf %6, %8 : vector<128x128xf32>
    %10 = math.absf %9 : vector<128x128xf32>
    %11 = vector.extract_strided_slice %10 {offsets = [0, 0], sizes = [8, 128], strides = [1, 1]} : vector<128x128xf32> to vector<8x128xf32>
    %12 = vector.extract_strided_slice %10 {offsets = [8, 0], sizes = [8, 128], strides = [1, 1]} : vector<128x128xf32> to vector<8x128xf32>
    %13 = arith.addf %11, %12 : vector<8x128xf32>
    %14 = vector.extract_strided_slice %10 {offsets = [16, 0], sizes = [8, 128], strides = [1, 1]} : vector<128x128xf32> to vector<8x128xf32>
    %15 = arith.addf %13, %14 : vector<8x128xf32>
    %16 = vector.extract_strided_slice %10 {offsets = [24, 0], sizes = [8, 128], strides = [1, 1]} : vector<128x128xf32> to vector<8x128xf32>
    %17 = arith.addf %15, %16 : vector<8x128xf32>
    %18 = vector.extract_strided_slice %10 {offsets = [32, 0], sizes = [8, 128], strides = [1, 1]} : vector<128x128xf32> to vector<8x128xf32>
    %19 = arith.addf %17, %18 : vector<8x128xf32>
    %20 = vector.extract_strided_slice %10 {offsets = [40, 0], sizes = [8, 128], strides = [1, 1]} : vector<128x128xf32> to vector<8x128xf32>
    %21 = arith.addf %19, %20 : vector<8x128xf32>
    %22 = vector.extract_strided_slice %10 {offsets = [48, 0], sizes = [8, 128], strides = [1, 1]} : vector<128x128xf32> to vector<8x128xf32>
    %23 = arith.addf %21, %22 : vector<8x128xf32>
    %24 = vector.extract_strided_slice %10 {offsets = [56, 0], sizes = [8, 128], strides = [1, 1]} : vector<128x128xf32> to vector<8x128xf32>
    %25 = arith.addf %23, %24 : vector<8x128xf32>
    %26 = vector.extract_strided_slice %10 {offsets = [64, 0], sizes = [8, 128], strides = [1, 1]} : vector<128x128xf32> to vector<8x128xf32>
    %27 = arith.addf %25, %26 : vector<8x128xf32>
    %28 = vector.extract_strided_slice %10 {offsets = [72, 0], sizes = [8, 128], strides = [1, 1]} : vector<128x128xf32> to vector<8x128xf32>
    %29 = arith.addf %27, %28 : vector<8x128xf32>
    %30 = vector.extract_strided_slice %10 {offsets = [80, 0], sizes = [8, 128], strides = [1, 1]} : vector<128x128xf32> to vector<8x128xf32>
    %31 = arith.addf %29, %30 : vector<8x128xf32>
    %32 = vector.extract_strided_slice %10 {offsets = [88, 0], sizes = [8, 128], strides = [1, 1]} : vector<128x128xf32> to vector<8x128xf32>
    %33 = arith.addf %31, %32 : vector<8x128xf32>
    %34 = vector.extract_strided_slice %10 {offsets = [96, 0], sizes = [8, 128], strides = [1, 1]} : vector<128x128xf32> to vector<8x128xf32>
    %35 = arith.addf %33, %34 : vector<8x128xf32>
    %36 = vector.extract_strided_slice %10 {offsets = [104, 0], sizes = [8, 128], strides = [1, 1]} : vector<128x128xf32> to vector<8x128xf32>
    %37 = arith.addf %35, %36 : vector<8x128xf32>
    %38 = vector.extract_strided_slice %10 {offsets = [112, 0], sizes = [8, 128], strides = [1, 1]} : vector<128x128xf32> to vector<8x128xf32>
    %39 = arith.addf %37, %38 : vector<8x128xf32>
    %40 = vector.extract_strided_slice %10 {offsets = [120, 0], sizes = [8, 128], strides = [1, 1]} : vector<128x128xf32> to vector<8x128xf32>
    %41 = arith.addf %39, %40 : vector<8x128xf32>
    %c0_9 = arith.constant 0 : index
    %c0_10 = arith.constant 0 : index
    %42 = vector.load %arg6[%c0_9, %c0_10] : memref<8x128xf32, #tpu.memory_space<vmem>>, vector<8x128xf32>
    tpu.vector_store %arg6[%c0_9, %c0_10], %41 {strides = array<i32>} : memref<8x128xf32, #tpu.memory_space<vmem>>, vector<8x128xf32>,
    return
  }
  func.func @transform_0(%arg0: i32) -> (i32, i32) {
    %c0_i32 = arith.constant 0 : i32
    %c0_i32_0 = arith.constant 0 : i32
    return %arg0, %c0_i32 : i32, i32
  }
  func.func @transform_1(%arg0: i32) -> (i32, i32) {
    %c0_i32 = arith.constant 0 : i32
    %c0_i32_0 = arith.constant 0 : i32
    %c0_i32_1 = arith.constant 0 : i32
    return %c0_i32, %c0_i32_0 : i32, i32
  }
  func.func @transform_2(%arg0: i32) -> (i32, i32) {
    %c0_i32 = arith.constant 0 : i32
    %c0_i32_0 = arith.constant 0 : i32
    %c0_i32_1 = arith.constant 0 : i32
    return %c0_i32, %c0_i32_0 : i32, i32
  }
  func.func @transform_3(%arg0: i32) -> (i32, i32) {
    %c0_i32 = arith.constant 0 : i32
    %c0_i32_0 = arith.constant 0 : i32
    return %arg0, %c0_i32 : i32, i32
  }
  func.func @transform_4(%arg0: i32) -> (i32, i32) {
    %c0_i32 = arith.constant 0 : i32
    %c0_i32_0 = arith.constant 0 : i32
    return %arg0, %c0_i32 : i32, i32
  }
  func.func @transform_5(%arg0: i32) -> (i32, i32) {
    %c0_i32 = arith.constant 0 : i32
    %c0_i32_0 = arith.constant 0 : i32
    return %arg0, %c0_i32 : i32, i32
  }
}

</mosaic_0001>

<bundles_post_ra>
// kernel: mul.9
= control target key start
LH: loop header
LB: loop body
LE: loop exit
PB: predicated region body
PF: predicated region fallthrough
CT: control target
= control target key end

     0   :  { %s34_s0 = inlined_call_operand.vmem [shape: f32[48], index: 0, kind: input, shape index: {}]   ;;  %s35_s1 = inlined_call_operand.vmem [shape: f32[48], index: 1, kind: input, shape index: {}]   ;;  %s36_s2 = inlined_call_operand.vmem [shape: f32[48], index: 2, kind: output, shape index: {}]  }
   0x1   :  { %v3_v0 = vld [vmem:[%s34_s0] sm:$0x1] }
   0x2   :  { %v4_v1 = vld [vmem:[%s35_s1] sm:$0x1] }
   0x3   :  { %v7_v2 = vmul.f32 %v4_v1, %v3_v0 }
   0x5   :  { %9 = vst [vmem:[%s36_s2] sm:$0x1] %v7_v2 }

// kernel: mul.6
= control target key start
LH: loop header
LB: loop body
LE: loop exit
PB: predicated region body
PF: predicated region fallthrough
CT: control target
= control target key end

     0   :  { %vm7_vm0 = vcmask 130048   ;;  %s30_s8 = smov 16   ;;  %vm13_vm1 = vcmask 392448   ;;  %vm19_vm2 = vcmask 261248   ;;  %s47_s0 = inlined_call_operand.vmem [shape: f32[3,16], index: 0, kind: input, shape index: {}]   ;;  %s48_s1 = inlined_call_operand.vmem [shape: f32[48], index: 1, kind: output, shape index: {}]  }
   0x1   :  { %v4_v0 = vld [vmem:[%s47_s0] sm:$0xf]  ;;  %s29_s0 = smov 32  }
   0x2   :  { %5 = vst [vmem:[#allocation1] sm:$0xf] %v4_v0 }
   0x9   :  { %v10_v1 = vld [vmem:[#allocation1 + $0x2] sm:$0x1]   ;;  %v6_v2 = vld [vmem:[#allocation1] sm:$0x1]   ;;  %v16_v3 = vld [vmem:[#allocation1 + $0x1] sm:$0x1]  }
   0xa   :  { %11 = vrot.lane.b32.xlu0 %v10_v1, %s29_s0  ;;  %8 = vst.msk [vmem:[#allocation0] sm:$0x1] %vm7_vm0, %v6_v2  }
   0xe   :  { %17 = vrot.lane.b32.xlu0 %v16_v3, %s30_s8 }
  0x7c   :  { %v12_v4 = vpop.permute.xlu0 %11  }
  0x7d   :  { %14 = vst.msk [vmem:[#allocation0] sm:$0x1] %vm13_vm1, %v12_v4  }
  0x80   :  { %v18_v5 = vpop.permute.xlu0 %17  }
  0x81   :  { %20 = vst.msk [vmem:[#allocation0] sm:$0x1] %vm19_vm2, %v18_v5  }
  0x88   :  { %v24_v6 = vld [vmem:[#allocation0] sm:$0x1] }
  0x89   :  { %26 = vst [vmem:[%s48_s1] sm:$0x1] %v24_v6 }

// kernel: cfpn_inference.2
= control target key start
LH: loop header
LB: loop body
LE: loop exit
PB: predicated region body
PF: predicated region fallthrough
CT: control target
= control target key end

     0   :  { %vm102_vm0 = vcmask 392192   ;;  %s442_s1 = inlined_call_operand.vmem [shape: bf16[48,128], index: 1, kind: input, shape index: {}]   ;;  %s443_s0 = inlined_call_operand.vmem [shape: bf16[128,48], index: 0, kind: input, shape index: {}]   ;;  %s444_s2 = inlined_call_operand.vmem [shape: f32[1,128], index: 2, kind: input, shape index: {}]   ;;  %s445_s3 = inlined_call_operand.vmem [shape: f32[128,128], index: 3, kind: output, shape index: {}]  }
   0x1   :  { %v319_v0 = vld [vmem:[%s442_s1] sm:$0xff]   ;;  %v320_v1 = vld [vmem:[%s442_s1 + $0x8] sm:$0xff]   ;;  %v321_v2 = vld [vmem:[%s442_s1 + $0x10] sm:$0xff]  }
   0x2   :  { %291 = vmatprep.subr.bf16.mxu0 %v319_v0  ;;  %313 = vmatprep.subr.bf16.mxu1 %v319_v0  ;;  %v322_v3 = vld [vmem:[%s443_s0] sm:$0xff]   ;;  %v324_v5 = vld [vmem:[%s443_s0 + $0x8] sm:$0xff]   ;;  %v326_v7 = vld [vmem:[%s443_s0 + $0x10] sm:$0xff]  }
   0x3   :  { %292 = vmatpush3.bf16.msra.mxu0 %v319_v0  ;;  %316 = vmatpush3.bf16.msra.mxu1 %v319_v0  ;;  %v323_v4 = vld [vmem:[%s443_s0 + $0x20] sm:$0xff]   ;;  %v325_v6 = vld [vmem:[%s443_s0 + $0x28] sm:$0xff]   ;;  %v327_v8 = vld [vmem:[%s443_s0 + $0x30] sm:$0xff]  }
   0x4   :  { %293 = vmatprep.subr.bf16.mxu0 %v320_v1  ;;  %314 = vmatprep.subr.bf16.mxu1 %v320_v1  ;;  %v328_v9 = vld [vmem:[%s443_s0 + $0x18] sm:$0xff]   ;;  %v260_v11 = vld [vmem:[%s444_s2] ss:$0 sm:$0xff] }
   0x5   :  { %297 = vmatprep.mubr.msk.bf16.mxu0 %vm102_vm0, %v322_v3  ;;  %305 = vmatprep.mubr.msk.bf16.mxu1 %vm102_vm0, %v323_v4  ;;  %v329_v10 = vld [vmem:[%s443_s0 + $0x38] sm:$0xff]  }
   0x7   :  { %294 = vmatpush3.bf16.msra.mxu0 %v320_v1  ;;  %317 = vmatpush3.bf16.msra.mxu1 %v320_v1 }
   0x8   :  { %295 = vmatprep.subr.bf16.mxu0 %v321_v2  ;;  %315 = vmatprep.subr.bf16.mxu1 %v321_v2 }
   0xb   :  { %296 = vmatpush3.bf16.msra.mxu0 %v321_v2  ;;  %318 = vmatpush3.bf16.msra.mxu1 %v321_v2 }
   0xe   :  { %298 = vmatmul.mubr.msk.bf16.vlgmr.msra.gmra.mrb[0].mxu0 %vm102_vm0, %v324_v5  ;;  %306 = vmatmul.mubr.msk.bf16.vlgmr.msra.gmra.mrb[0].mxu1 %vm102_vm0, %v325_v6 }
   0xf   :  { %301 = vmatprep.mubr.msk.bf16.mxu0 %vm102_vm0, %v326_v7  ;;  %309 = vmatprep.mubr.msk.bf16.mxu1 %vm102_vm0, %v327_v8 }
  0x16   :  { %302 = vmatmul.mubr.msk.bf16.gmra.mrb[4].mxu0 %vm102_vm0, %v328_v9  ;;  %310 = vmatmul.mubr.msk.bf16.gmra.mrb[4].mxu1 %vm102_vm0, %v329_v10 }
  0xe1   :  { %v299_v12 = vpop.f32.mrb[0].mxu0  ;;  %v307_v13 = vpop.f32.mrb[0].mxu1 }
  0xe2   :  { %v170_v14 = vadd.f32 %v299_v12, %v260_v11  ;;  %v202_v15 = vadd.f32 %v307_v13, %v260_v11  ;;  %v161_v16 = vpop.f32.mrb[1].mxu0  ;;  %v193_v17 = vpop.f32.mrb[1].mxu1 }
  0xe3   :  { %v162_v18 = vadd.f32 %v260_v11, %v161_v16  ;;  %v194_v19 = vadd.f32 %v260_v11, %v193_v17  ;;  %v300_v20 = vpop.f32.mrb[2].mxu0  ;;  %v308_v21 = vpop.f32.mrb[2].mxu1 }
  0xe4   :  { %v226_v22 = vmax.f32 %v170_v14, 0.0  ;;  %v234_v23 = vmax.f32 %v202_v15, 0.0  ;;  %v173_v24 = vadd.f32 %v300_v20, %v260_v11  ;;  %v205_v25 = vadd.f32 %v308_v21, %v260_v11  ;;  %v164_v26 = vpop.f32.mrb[3].mxu0  ;;  %v196_v27 = vpop.f32.mrb[3].mxu1 }
  0xe5   :  { %v224_v28 = vmax.f32 %v162_v18, 0.0  ;;  %v232_v29 = vmax.f32 %v194_v19, 0.0  ;;  %v165_v30 = vadd.f32 %v260_v11, %v164_v26  ;;  %v197_v31 = vadd.f32 %v260_v11, %v196_v27 }
  0xe6   :  { %242 = vst [vmem:[%s445_s3 + $0x10] sm:$0xff] %v226_v22  ;;  %250 = vst [vmem:[%s445_s3 + $0x50] sm:$0xff] %v234_v23  ;;  %v227_v32 = vmax.f32 %v173_v24, 0.0  ;;  %v235_v33 = vmax.f32 %v205_v25, 0.0 }
  0xe7   :  { %240 = vst [vmem:[%s445_s3] sm:$0xff] %v224_v28  ;;  %248 = vst [vmem:[%s445_s3 + $0x40] sm:$0xff] %v232_v29  ;;  %v225_v34 = vmax.f32 %v165_v30, 0.0  ;;  %v233_v35 = vmax.f32 %v197_v31, 0.0 }
  0xe8   :  { %243 = vst [vmem:[%s445_s3 + $0x18] sm:$0xff] %v227_v32  ;;  %251 = vst [vmem:[%s445_s3 + $0x58] sm:$0xff] %v235_v33 }
  0xe9   :  { %241 = vst [vmem:[%s445_s3 + $0x8] sm:$0xff] %v225_v34  ;;  %249 = vst [vmem:[%s445_s3 + $0x48] sm:$0xff] %v233_v35  ;;  %v303_v36 = vpop.f32.mrb[4].mxu0  ;;  %v311_v37 = vpop.f32.mrb[4].mxu1 }
  0xea   :  { %v186_v38 = vadd.f32 %v303_v36, %v260_v11  ;;  %v218_v39 = vadd.f32 %v311_v37, %v260_v11  ;;  %v177_v40 = vpop.f32.mrb[5].mxu0  ;;  %v209_v41 = vpop.f32.mrb[5].mxu1 }
  0xeb   :  { %v178_v42 = vadd.f32 %v260_v11, %v177_v40  ;;  %v210_v43 = vadd.f32 %v260_v11, %v209_v41  ;;  %v304_v44 = vpop.f32.mrb[6].mxu0  ;;  %v312_v45 = vpop.f32.mrb[6].mxu1 }
  0xec   :  { %v230_v46 = vmax.f32 %v186_v38, 0.0  ;;  %v238_v47 = vmax.f32 %v218_v39, 0.0  ;;  %v189_v48 = vadd.f32 %v304_v44, %v260_v11  ;;  %v221_v49 = vadd.f32 %v312_v45, %v260_v11  ;;  %v180_v50 = vpop.f32.mrb[7].mxu0  ;;  %v212_v51 = vpop.f32.mrb[7].mxu1 }
  0xed   :  { %v228_v52 = vmax.f32 %v178_v42, 0.0  ;;  %v236_v53 = vmax.f32 %v210_v43, 0.0  ;;  %v181_v54 = vadd.f32 %v260_v11, %v180_v50  ;;  %v213_v55 = vadd.f32 %v260_v11, %v212_v51 }
  0xee   :  { %246 = vst [vmem:[%s445_s3 + $0x30] sm:$0xff] %v230_v46  ;;  %254 = vst [vmem:[%s445_s3 + $0x70] sm:$0xff] %v238_v47  ;;  %v231_v56 = vmax.f32 %v189_v48, 0.0  ;;  %v239_v57 = vmax.f32 %v221_v49, 0.0 }
  0xef   :  { %244 = vst [vmem:[%s445_s3 + $0x20] sm:$0xff] %v228_v52  ;;  %252 = vst [vmem:[%s445_s3 + $0x60] sm:$0xff] %v236_v53  ;;  %v229_v58 = vmax.f32 %v181_v54, 0.0  ;;  %v237_v59 = vmax.f32 %v213_v55, 0.0 }
  0xf0   :  { %247 = vst [vmem:[%s445_s3 + $0x38] sm:$0xff] %v231_v56  ;;  %255 = vst [vmem:[%s445_s3 + $0x78] sm:$0xff] %v239_v57 }
  0xf1   :  { %245 = vst [vmem:[%s445_s3 + $0x28] sm:$0xff] %v229_v58  ;;  %253 = vst [vmem:[%s445_s3 + $0x68] sm:$0xff] %v237_v59 }

// kernel: cfpn_inference.3
= control target key start
LH: loop header
LB: loop body
LE: loop exit
PB: predicated region body
PF: predicated region fallthrough
CT: control target
= control target key end

     0   :  { %s623_s1 = inlined_call_operand.vmem [shape: bf16[128,128], index: 1, kind: input, shape index: {}]   ;;  %s624_s0 = inlined_call_operand.vmem [shape: f32[128,128], index: 0, kind: input, shape index: {}]   ;;  %s625_s2 = inlined_call_operand.vmem [shape: f32[1,128], index: 2, kind: input, shape index: {}]   ;;  %s626_s3 = inlined_call_operand.vmem [shape: f32[128,128], index: 3, kind: input, shape index: {}]   ;;  %s627_s4 = inlined_call_operand.vmem [shape: f32[128,128], index: 4, kind: output, shape index: {0}]   ;;  %s628_s5 = inlined_call_operand.vmem [shape: f32[8,128], index: 5, kind: output, shape index: {1}]  }
   0x1   :  { %v373_v0 = vld [vmem:[%s623_s1] sm:$0xff]   ;;  %v374_v1 = vld [vmem:[%s623_s1 + $0x8] sm:$0xff]   ;;  %v375_v2 = vld [vmem:[%s623_s1 + $0x10] sm:$0xff]  }
   0x2   :  { %325 = vmatprep.subr.bf16.mxu0 %v373_v0  ;;  %357 = vmatprep.subr.bf16.mxu1 %v373_v0  ;;  %v376_v3 = vld [vmem:[%s623_s1 + $0x18] sm:$0xff]   ;;  %v20_v4 = vld [vmem:[%s624_s0] sm:$0xff]  ;;  %v21_v5 = vld [vmem:[%s624_s0 + $0x8] sm:$0xff] }
   0x3   :  { %326 = vmatpush3.bf16.msra.mxu0 %v373_v0  ;;  %365 = vmatpush3.bf16.msra.mxu1 %v373_v0  ;;  %v36_v6 = vpack.c.bf16 %v21_v5, %v20_v4  ;;  %v28_v7 = vld [vmem:[%s624_s0 + $0x40] sm:$0xff]  ;;  %v29_v8 = vld [vmem:[%s624_s0 + $0x48] sm:$0xff]  ;;  %v379_v12 = vld [vmem:[%s623_s1 + $0x30] sm:$0xff]  }
   0x4   :  { %327 = vmatprep.subr.bf16.mxu0 %v374_v1  ;;  %358 = vmatprep.subr.bf16.mxu1 %v374_v1  ;;  %v377_v9 = vld [vmem:[%s623_s1 + $0x20] sm:$0xff]   ;;  %v40_v10 = vpack.c.bf16 %v29_v8, %v28_v7  ;;  %v378_v11 = vld [vmem:[%s623_s1 + $0x28] sm:$0xff]   ;;  %v380_v13 = vld [vmem:[%s623_s1 + $0x38] sm:$0xff]  }
   0x5   :  { %341 = vmatprep.mubr.bf16.mxu0 %v36_v6  ;;  %v22_v14 = vld [vmem:[%s624_s0 + $0x10] sm:$0xff]  ;;  %v23_v15 = vld [vmem:[%s624_s0 + $0x18] sm:$0xff]  ;;  %v24_v16 = vld [vmem:[%s624_s0 + $0x20] sm:$0xff] }
   0x6   :  { %349 = vmatprep.mubr.bf16.mxu1 %v40_v10  ;;  %v30_v17 = vld [vmem:[%s624_s0 + $0x50] sm:$0xff]  ;;  %v31_v18 = vld [vmem:[%s624_s0 + $0x58] sm:$0xff]  ;;  %v25_v19 = vld [vmem:[%s624_s0 + $0x28] sm:$0xff]  ;;  %v37_v22 = vpack.c.bf16 %v23_v15, %v22_v14 }
   0x7   :  { %328 = vmatpush3.bf16.msra.mxu0 %v374_v1  ;;  %366 = vmatpush3.bf16.msra.mxu1 %v374_v1  ;;  %v32_v20 = vld [vmem:[%s624_s0 + $0x60] sm:$0xff]  ;;  %v33_v21 = vld [vmem:[%s624_s0 + $0x68] sm:$0xff]  ;;  %v41_v23 = vpack.c.bf16 %v31_v18, %v30_v17  ;;  %v38_v24 = vpack.c.bf16 %v25_v19, %v24_v16  ;;  %v26_v26 = vld [vmem:[%s624_s0 + $0x30] sm:$0xff] }
   0x8   :  { %329 = vmatprep.subr.bf16.mxu0 %v375_v2  ;;  %359 = vmatprep.subr.bf16.mxu1 %v375_v2  ;;  %v42_v25 = vpack.c.bf16 %v33_v21, %v32_v20  ;;  %v27_v27 = vld [vmem:[%s624_s0 + $0x38] sm:$0xff]  ;;  %v34_v28 = vld [vmem:[%s624_s0 + $0x70] sm:$0xff]  ;;  %v486_v32 = vld [vmem:[%s625_s2] ss:$0 sm:$0xff] }
   0x9   :  { %v35_v29 = vld [vmem:[%s624_s0 + $0x78] sm:$0xff]  ;;  %v39_v30 = vpack.c.bf16 %v27_v27, %v26_v26  ;;  %v228_v37 = vld [vmem:[%s626_s3] sm:$0xff]  ;;  %v230_v44 = vld [vmem:[%s626_s3 + $0x10] sm:$0xff] }
   0xa   :  { %v43_v31 = vpack.c.bf16 %v35_v29, %v34_v28  ;;  %v229_v47 = vld [vmem:[%s626_s3 + $0x8] sm:$0xff]  ;;  %v231_v53 = vld [vmem:[%s626_s3 + $0x18] sm:$0xff]  ;;  %v232_v63 = vld [vmem:[%s626_s3 + $0x20] sm:$0xff] }
   0xb   :  { %330 = vmatpush3.bf16.msra.mxu0 %v375_v2  ;;  %367 = vmatpush3.bf16.msra.mxu1 %v375_v2  ;;  %v234_v8 = vld [vmem:[%s626_s3 + $0x30] sm:$0xff]  ;;  %v235_v18 = vld [vmem:[%s626_s3 + $0x38] sm:$0xff]  ;;  %v236_v19 = vld [vmem:[%s626_s3 + $0x40] sm:$0xff] }
   0xc   :  { %331 = vmatprep.subr.bf16.mxu0 %v376_v3  ;;  %360 = vmatprep.subr.bf16.mxu1 %v376_v3  ;;  %v237_v29 = vld [vmem:[%s626_s3 + $0x48] sm:$0xff] }
   0xf   :  { %332 = vmatpush3.bf16.msra.mxu0 %v376_v3  ;;  %368 = vmatpush3.bf16.msra.mxu1 %v376_v3 }
  0x10   :  { %333 = vmatprep.subr.bf16.mxu0 %v377_v9  ;;  %361 = vmatprep.subr.bf16.mxu1 %v377_v9 }
  0x13   :  { %334 = vmatpush3.bf16.msra.mxu0 %v377_v9  ;;  %369 = vmatpush3.bf16.msra.mxu1 %v377_v9 }
  0x14   :  { %335 = vmatprep.subr.bf16.mxu0 %v378_v11  ;;  %362 = vmatprep.subr.bf16.mxu1 %v378_v11 }
  0x17   :  { %336 = vmatpush3.bf16.msra.mxu0 %v378_v11  ;;  %370 = vmatpush3.bf16.msra.mxu1 %v378_v11  ;;  %v233_v11 = vld [vmem:[%s626_s3 + $0x28] sm:$0xff] }
  0x18   :  { %337 = vmatprep.subr.bf16.mxu0 %v379_v12  ;;  %363 = vmatprep.subr.bf16.mxu1 %v379_v12 }
  0x1b   :  { %338 = vmatpush3.bf16.msra.mxu0 %v379_v12  ;;  %371 = vmatpush3.bf16.msra.mxu1 %v379_v12 }
  0x1c   :  { %339 = vmatprep.subr.bf16.mxu0 %v380_v13  ;;  %364 = vmatprep.subr.bf16.mxu1 %v380_v13 }
  0x1f   :  { %340 = vmatpush3.bf16.msra.mxu0 %v380_v13  ;;  %372 = vmatpush3.bf16.msra.mxu1 %v380_v13 }
  0x22   :  { %342 = vmatmul.mubr.bf16.vlgmr.msra.gmra.mrb[0].mxu0 %v37_v22  ;;  %350 = vmatmul.mubr.bf16.vlgmr.msra.gmra.mrb[0].mxu1 %v41_v23 }
  0x23   :  { %345 = vmatprep.mubr.bf16.mxu0 %v38_v24  ;;  %353 = vmatprep.mubr.bf16.mxu1 %v42_v25 }
  0x2a   :  { %346 = vmatmul.mubr.bf16.gmra.mrb[4].mxu0 %v39_v30  ;;  %354 = vmatmul.mubr.bf16.gmra.mrb[4].mxu1 %v43_v31 }
  0xf5   :  { %v343_v33 = vpop.f32.mrb[0].mxu0  ;;  %v351_v34 = vpop.f32.mrb[0].mxu1 }
  0xf6   :  { %v158_v35 = vadd.f32 %v343_v33, %v486_v32  ;;  %v149_v36 = vpop.f32.mrb[1].mxu0  ;;  %v493_v38 = vadd.f32 %v351_v34, %v486_v32  ;;  %v181_v39 = vpop.f32.mrb[1].mxu1  ;;  %v238_v33 = vld [vmem:[%s626_s3 + $0x50] sm:$0xff] }
  0xf7   :  { %v150_v40 = vadd.f32 %v486_v32, %v149_v36  ;;  %v344_v41 = vpop.f32.mrb[2].mxu0  ;;  %v497_v42 = vadd.f32 %v486_v32, %v181_v39  ;;  %v352_v43 = vpop.f32.mrb[2].mxu1  ;;  %v240_v39 = vld [vmem:[%s626_s3 + $0x60] sm:$0xff] }
  0xf8   :  { %214 = vst [vmem:[%s627_s4 + $0x10] sm:$0xff] %v158_v35  ;;  %v161_v45 = vadd.f32 %v344_v41, %v486_v32  ;;  %v152_v46 = vpop.f32.mrb[3].mxu0  ;;  %222 = vst [vmem:[%s627_s4 + $0x50] sm:$0xff] %v493_v38  ;;  %v514_v48 = vadd.f32 %v352_v43, %v486_v32  ;;  %v184_v49 = vpop.f32.mrb[3].mxu1  ;;  %v246_v54 = vsub.f32 %v158_v35, %v230_v44 }
  0xf9   :  { %212 = vst [vmem:[%s627_s4] sm:$0xff] %v150_v40  ;;  %v244_v50 = vsub.f32 %v150_v40, %v228_v37  ;;  %v153_v51 = vadd.f32 %v486_v32, %v152_v46  ;;  %220 = vst [vmem:[%s627_s4 + $0x40] sm:$0xff] %v497_v42  ;;  %v525_v52 = vadd.f32 %v486_v32, %v184_v49  ;;  %v239_v37 = vld [vmem:[%s626_s3 + $0x58] sm:$0xff]  ;;  %v241_v46 = vld [vmem:[%s626_s3 + $0x68] sm:$0xff] }
  0xfa   :  { %215 = vst [vmem:[%s627_s4 + $0x18] sm:$0xff] %v161_v45  ;;  %223 = vst [vmem:[%s627_s4 + $0x58] sm:$0xff] %v514_v48  ;;  %v247_v57 = vsub.f32 %v161_v45, %v231_v53  ;;  %v262_v2 = vand.u32 2147483647, %v246_v54  ;;  %v252_v28 = vsub.f32 %v497_v42, %v236_v19  ;;  %v254_v40 = vsub.f32 %v493_v38, %v238_v33 }
  0xfb   :  { %213 = vst [vmem:[%s627_s4 + $0x8] sm:$0xff] %v153_v51  ;;  %v245_v55 = vsub.f32 %v153_v51, %v229_v47  ;;  %221 = vst [vmem:[%s627_s4 + $0x48] sm:$0xff] %v525_v52  ;;  %v260_v56 = vand.u32 2147483647, %v244_v50  ;;  %v253_v36 = vsub.f32 %v525_v52, %v237_v29  ;;  %v255_v43 = vsub.f32 %v514_v48, %v239_v37  ;;  %v242_v50 = vld [vmem:[%s626_s3 + $0x70] sm:$0xff]  ;;  %v243_v48 = vld [vmem:[%s626_s3 + $0x78] sm:$0xff] }
  0xfc   :  { %v263_v14 = vand.u32 2147483647, %v247_v57  ;;  %v268_v35 = vand.u32 2147483647, %v252_v28  ;;  %v270_v47 = vand.u32 2147483647, %v254_v40 }
  0xfd   :  { %v261_v58 = vand.u32 2147483647, %v245_v55  ;;  %v347_v59 = vpop.f32.mrb[4].mxu0  ;;  %v355_v60 = vpop.f32.mrb[4].mxu1  ;;  %v269_v44 = vand.u32 2147483647, %v253_v36 }
  0xfe   :  { %v174_v61 = vadd.f32 %v347_v59, %v486_v32  ;;  %v165_v62 = vpop.f32.mrb[5].mxu0  ;;  %v549_v0 = vadd.f32 %v355_v60, %v486_v32  ;;  %v197_v1 = vpop.f32.mrb[5].mxu1  ;;  %v271_v51 = vand.u32 2147483647, %v255_v43 }
  0xff   :  { %v276_v3 = vadd.f32 %v261_v58, %v260_v56  ;;  %v166_v4 = vadd.f32 %v486_v32, %v165_v62  ;;  %v348_v5 = vpop.f32.mrb[6].mxu0  ;;  %v198_v6 = vadd.f32 %v486_v32, %v197_v1  ;;  %v356_v7 = vpop.f32.mrb[6].mxu1 }
 0x100   :  { %218 = vst [vmem:[%s627_s4 + $0x30] sm:$0xff] %v174_v61  ;;  %v177_v9 = vadd.f32 %v348_v5, %v486_v32  ;;  %v168_v10 = vpop.f32.mrb[7].mxu0  ;;  %226 = vst [vmem:[%s627_s4 + $0x70] sm:$0xff] %v549_v0  ;;  %v209_v12 = vadd.f32 %v356_v7, %v486_v32  ;;  %v200_v13 = vpop.f32.mrb[7].mxu1  ;;  %v250_v20 = vsub.f32 %v174_v61, %v234_v8 }
 0x101   :  { %v277_v15 = vadd.f32 %v276_v3, %v262_v2  ;;  %216 = vst [vmem:[%s627_s4 + $0x20] sm:$0xff] %v166_v4  ;;  %v248_v16 = vsub.f32 %v166_v4, %v232_v63  ;;  %v169_v17 = vadd.f32 %v486_v32, %v168_v10  ;;  %224 = vst [vmem:[%s627_s4 + $0x60] sm:$0xff] %v198_v6 }
 0x102   :  { %219 = vst [vmem:[%s627_s4 + $0x38] sm:$0xff] %v177_v9  ;;  %227 = vst [vmem:[%s627_s4 + $0x78] sm:$0xff] %v209_v12  ;;  %v201_v24 = vadd.f32 %v486_v32, %v200_v13  ;;  %v251_v26 = vsub.f32 %v177_v9, %v235_v18  ;;  %v266_v30 = vand.u32 2147483647, %v250_v20  ;;  %v256_v45 = vsub.f32 %v198_v6, %v240_v39 }
 0x103   :  { %v264_v21 = vand.u32 2147483647, %v248_v16  ;;  %v278_v22 = vadd.f32 %v277_v15, %v263_v14  ;;  %217 = vst [vmem:[%s627_s4 + $0x28] sm:$0xff] %v169_v17  ;;  %v249_v23 = vsub.f32 %v169_v17, %v233_v11  ;;  %v258_v54 = vsub.f32 %v549_v0, %v242_v50 }
 0x104   :  { %225 = vst [vmem:[%s627_s4 + $0x68] sm:$0xff] %v201_v24  ;;  %v267_v32 = vand.u32 2147483647, %v251_v26  ;;  %v272_v53 = vand.u32 2147483647, %v256_v45  ;;  %v257_v38 = vsub.f32 %v201_v24, %v241_v46  ;;  %v259_v57 = vsub.f32 %v209_v12, %v243_v48 }
 0x105   :  { %v279_v25 = vadd.f32 %v278_v22, %v264_v21  ;;  %v265_v27 = vand.u32 2147483647, %v249_v23  ;;  %v274_v59 = vand.u32 2147483647, %v258_v54 }
 0x106   :  { %v273_v58 = vand.u32 2147483647, %v257_v38  ;;  %v275_v61 = vand.u32 2147483647, %v259_v57 }
 0x107   :  { %v280_v31 = vadd.f32 %v279_v25, %v265_v27 }
 0x109   :  { %v281_v34 = vadd.f32 %v280_v31, %v266_v30 }
 0x10b   :  { %v282_v41 = vadd.f32 %v281_v34, %v267_v32 }
 0x10d   :  { %v283_v42 = vadd.f32 %v282_v41, %v268_v35 }
 0x10f   :  { %v284_v49 = vadd.f32 %v283_v42, %v269_v44 }
 0x111   :  { %v285_v52 = vadd.f32 %v284_v49, %v270_v47 }
 0x113   :  { %v286_v55 = vadd.f32 %v285_v52, %v271_v51 }
 0x115   :  { %v287_v56 = vadd.f32 %v286_v55, %v272_v53 }
 0x117   :  { %v288_v60 = vadd.f32 %v287_v56, %v273_v58 }
 0x119   :  { %v289_v62 = vadd.f32 %v288_v60, %v274_v59 }
 0x11b   :  { %v290_v63 = vadd.f32 %v289_v62, %v275_v61 }
 0x11d   :  { %291 = vst [vmem:[%s628_s5] sm:$0xff] %v290_v63 }

</bundles_post_ra>
